<compile_context>
chip_gen: v6e
topology: v6e:2x2x1
jax: 0.10.0
libtpu: 0.0.40
codegen_flags: <defaults>
</compile_context>

<pallas_src>
import math

import jax
import jax.numpy as jnp
from jax.experimental import pallas as pl
from jax.experimental.pallas import tpu as pltpu


# ---------------------------------------------------------------------------
# Static pooling geometry (identical formulas to SPPLayer.forward).
# ---------------------------------------------------------------------------
def _level_params(H, W, num_levels):
    params = []
    for i in range(num_levels):
        kh = math.ceil(H / 2 ** i)
        kw = math.ceil(W / 2 ** i)
        ph = (kh * 2 ** i - H + 1) // 2
        pw = (kw * 2 ** i - W + 1) // 2
        # F.max_pool2d / F.avg_pool2d output size with stride == kernel, ceil_mode=False
        oh = (H + 2 * ph - kh) // kh + 1
        ow = (W + 2 * pw - kw) // kw + 1
        params.append((kh, kw, ph, pw, oh, ow))
    return params


def _clip_bin(idx, k, p, n):
    """Valid (unclipped-by-padding) range of bin `idx` for kernel k, pad p, extent n."""
    return max(0, idx * k - p), min(n, (idx + 1) * k - p)


def _axis_composes(kp, pp, op_, kc, pc, oc, n):
    """Static check: level-i bins along one axis == unions of pairs of level-(i+1) bins."""
    if oc != 2 * op_:
        return False
    for r in range(op_):
        p0, p1 = _clip_bin(r, kp, pp, n)
        c0 = max(0, (2 * r) * kc - pc)          # union of children 2r, 2r+1 (contiguous)
        c1 = min(n, (2 * r + 2) * kc - pc)
        if p1 <= p0 and c1 <= c0:
            continue                            # both windows fully padded -> both emit fill
        if (p0, p1) != (c0, c1):
            return False
    return True


def _build_plan(H, W, params):
    """'hier': derive level i from level i+1's pooled bins; 'direct': pool from the input."""
    plan = ['direct'] * len(params)
    for i in range(len(params) - 1):
        khp, kwp, php, pwp, ohp, owp = params[i]
        khc, kwc, phc, pwc, ohc, owc = params[i + 1]
        if (_axis_composes(khp, php, ohp, khc, phc, ohc, H)
                and _axis_composes(kwp, pwp, owp, kwc, pwc, owc, W)):
            plan[i] = 'hier'
    return plan


# ---------------------------------------------------------------------------
# VMEM-aware, generation-aware channel tiling.
# ---------------------------------------------------------------------------
def _round_up(x, m):
    return ((x + m - 1) // m) * m


def _vmem_capacity_bytes():
    try:
        cap = getattr(pltpu.get_tpu_info(), "vmem_capacity_bytes", None)
        if cap:
            return int(cap)
    except Exception:
        pass
    return 64 * 1024 * 1024      # conservative fallback = v7x physical VMEM per TensorCore


def _per_channel_vmem_bytes(H, W, itemsize, level_params):
    """Padded-VMEM footprint (8x128 tile granularity) of one channel's input + outputs."""
    in_bytes = _round_up(H, 8) * _round_up(W, 128) * itemsize
    out_bytes = sum(_round_up(oh, 8) * _round_up(ow, 128) * itemsize
                    for (_, _, _, _, oh, ow) in level_params)
    return in_bytes + out_bytes


def _choose_tile_c(B, C, H, W, itemsize, level_params, vmem_cap):
    per_chan = _per_channel_vmem_bytes(H, W, itemsize, level_params)
    budget = int(0.4 * vmem_cap)               # keep double-buffering alive + headroom
    max_tc = max(1, budget // (2 * per_chan))  # 2x: BlockSpec double-buffers each block
    divisors = [d for d in range(1, C + 1) if C % d == 0]
    fitting = [d for d in divisors if d <= max_tc]
    tc = max(fitting) if fitting else 1
    # TODO(synk): tile H as well if even a single channel overflows the VMEM budget.
    if B == 1 and tc == C and C > 1:
        # v7x has 2 TensorCores: make sure the "parallel" grid has at least 2 steps.
        proper = [d for d in fitting if d < C]
        if proper:
            tc = max(proper)
    return tc


def _vmem_limit_bytes(tc, H, W, itemsize, level_params, vmem_cap):
    need = 2 * tc * _per_channel_vmem_bytes(H, W, itemsize, level_params) + (8 << 20)
    return int(min(max(need, 32 << 20), int(0.95 * vmem_cap)))


# ---------------------------------------------------------------------------
# Fused kernel: one (1, TC, H, W) input block -> all levels' (1, TC, oh, ow) outputs.
# ---------------------------------------------------------------------------
_ROW_CHUNK = 8   # one sublane group per chunk; bounds unrolled code for long windows


def _make_spp_kernel(H, W, level_params, plan, pool_type, in_dtype):
    is_max = pool_type == 'max_pool'
    num_levels = len(level_params)
    # Max: reduce natively in the input dtype (bf16 stays bf16 on v6e/v7x).
    # Avg: carry per-bin SUMS in f32, scale by 1/(kh*kw) only at the output store.
    red_dtype = in_dtype if is_max else jnp.float32
    if is_max:
        fill = (-jnp.inf if jnp.issubdtype(jnp.dtype(in_dtype), jnp.floating)
                else jnp.iinfo(in_dtype).min)
    else:
        fill = 0.0

    def row_window_reduce(x_ref, r0, r1):
        """Reduce input rows [r0, r1) of the (1, TC, H, W) block -> (TC, W)."""
        acc = None
        rr = r0
        while rr < r1:
            cl = min(_ROW_CHUNK, r1 - rr)
            seg = x_ref[0, :, rr:rr + cl, :]               # (TC, cl, W) static slice
            if not is_max:
                seg = seg.astype(red_dtype)
            part = jnp.max(seg, axis=1) if is_max else jnp.sum(seg, axis=1)
            if acc is None:
                acc = part
            else:
                acc = jnp.maximum(acc, part) if is_max else acc + part
            rr += cl
        return acc                                          # (TC, W)

    def direct_level(x_ref, tc, kh, kw, ph, pw, oh, ow):
        """Pool straight from the input block: vals[r][s] is a (TC, 1) max / unscaled sum."""
        vals = [[None] * ow for _ in range(oh)]
        for r in range(oh):
            r0, r1 = _clip_bin(r, kh, ph, H)
            if r1 <= r0:
                # Fully padded row band: emit the fill directly (no (TC, W) materialization).
                for s in range(ow):
                    vals[r][s] = jnp.full((tc, 1), fill, red_dtype)
                continue
            red = row_window_reduce(x_ref, r0, r1)          # (TC, W)
            for s in range(ow):
                c0, c1 = _clip_bin(s, kw, pw, W)
                if c1 <= c0:
                    vals[r][s] = jnp.full((tc, 1), fill, red_dtype)
                elif is_max:
                    vals[r][s] = jnp.max(red[:, c0:c1], axis=1, keepdims=True)
                else:
                    vals[r][s] = jnp.sum(red[:, c0:c1], axis=1, keepdims=True)
        return vals

    def hier_level(child, oh, ow):
        """Pool a level from the next-finer level's bins: pure elementwise (TC, 1) ops."""
        vals = [[None] * ow for _ in range(oh)]
        for r in range(oh):
            for s in range(ow):
                a = child[2 * r][2 * s]
                b = child[2 * r][2 * s + 1]
                c = child[2 * r + 1][2 * s]
                d = child[2 * r + 1][2 * s + 1]
                if is_max:
                    vals[r][s] = jnp.maximum(jnp.maximum(a, b), jnp.maximum(c, d))
                else:
                    vals[r][s] = (a + b) + (c + d)
        return vals

    def kernel(x_ref, *out_refs):
        tc = x_ref.shape[1]
        pooled = {}
        # Finest level first; coarser levels reuse its bins wherever the static
        # geometry composes (input block is read from VMEM only once in that case).
        for i in reversed(range(num_levels)):
            kh, kw, ph, pw, oh, ow = level_params[i]
            if plan[i] == 'hier':
                vals = hier_level(pooled[i + 1], oh, ow)
            else:
                vals = direct_level(x_ref, tc, kh, kw, ph, pw, oh, ow)
            pooled[i] = vals
            # Assemble (TC, oh, ow) once and store the whole level with a single write.
            rows = [jnp.concatenate(vals[r], axis=1)[:, None, :] for r in range(oh)]
            full = rows[0] if oh == 1 else jnp.concatenate(rows, axis=1)
            if not is_max:
                full = full * (1.0 / float(kh * kw))        # count_include_pad=True divisor
            out_refs[i][0] = full.astype(out_refs[i].dtype)

    return kernel


# ---------------------------------------------------------------------------
# Wrapper (NCHW in, flattened-NCHW concat out -- matches torch .view(batch, -1)).
# ---------------------------------------------------------------------------
def spp_layer(x, num_levels, pool_type='max_pool'):
    B, C, H, W = x.shape
    params = _level_params(H, W, num_levels)
    plan = _build_plan(H, W, params)
    itemsize = jnp.dtype(x.dtype).itemsize
    vmem_cap = _vmem_capacity_bytes()
    tc = _choose_tile_c(B, C, H, W, itemsize, params, vmem_cap)
    vmem_limit = _vmem_limit_bytes(tc, H, W, itemsize, params, vmem_cap)

    kernel = _make_spp_kernel(H, W, params, plan, pool_type, x.dtype)
    out_shapes = tuple(jax.ShapeDtypeStruct((B, C, oh, ow), x.dtype)
                       for (_, _, _, _, oh, ow) in params)
    in_specs = [pl.BlockSpec((1, tc, H, W), lambda b, c: (b, c, 0, 0))]
    out_specs = tuple(pl.BlockSpec((1, tc, oh, ow), lambda b, c: (b, c, 0, 0))
                      for (_, _, _, _, oh, ow) in params)

    outs = pl.pallas_call(
        kernel,
        out_shape=out_shapes,
        grid=(B, C // tc),
        in_specs=in_specs,
        out_specs=out_specs,
        compiler_params=pltpu.CompilerParams(
            dimension_semantics=("parallel", "parallel"),
            vmem_limit_bytes=vmem_limit),
    )(x)

    # Outputs are already NCHW, so reshape(B, -1) matches torch's .view(batch, -1).
    return jnp.concatenate([p.reshape(B, -1) for p in outs], axis=-1)


# ---------------------------------------------------------------------------
# Pure-JAX reference mirroring F.max_pool2d / F.avg_pool2d(count_include_pad=True).
# ---------------------------------------------------------------------------
def _reference_spp(x, num_levels, pool_type='max_pool'):
    B, C, H, W = x.shape
    feats = []
    for (kh, kw, ph, pw, oh, ow) in _level_params(H, W, num_levels):
        pad_val = -jnp.inf if pool_type == 'max_pool' else 0.0
        xp = jnp.pad(x, ((0, 0), (0, 0), (ph, ph), (pw, pw)), constant_values=pad_val)
        xp = xp[:, :, :oh * kh, :ow * kw]
        xr = xp.reshape(B, C, oh, kh, ow, kw)
        if pool_type == 'max_pool':
            pooled = jnp.max(xr, axis=(3, 5))
        else:
            pooled = jnp.mean(xr, axis=(3, 5))
        feats.append(pooled.reshape(B, -1))
    return jnp.concatenate(feats, axis=-1)


if __name__ == "__main__":
    key = jax.random.PRNGKey(0)
    B, C, H, W = 2, 4, 16, 16
    x = jax.random.normal(key, (B, C, H, W), dtype=jnp.float32)

    # 3-level pyramid: per-batch features = C * (1 + 4 + 16) = 84.
    out_max = jax.block_until_ready(spp_layer(x, 3, 'max_pool'))
    ref_max = _reference_spp(x, 3, 'max_pool')
    assert out_max.shape == (B, C * (1 + 4 + 16)), out_max.shape
    assert jnp.allclose(out_max, ref_max, atol=1e-6, rtol=1e-6), "max_pool mismatch"

    out_avg = jax.block_until_ready(spp_layer(x, 3, 'avg_pool'))
    ref_avg = _reference_spp(x, 3, 'avg_pool')
    assert jnp.allclose(out_avg, ref_avg, atol=1e-5, rtol=1e-5), "avg_pool mismatch"

    # num_levels=1 exercises the long-window (chunked) row-reduction path (kh == H)
    # with no hierarchical reuse.
    out1 = jax.block_until_ready(spp_layer(x, 1, 'max_pool'))
    ref1 = _reference_spp(x, 1, 'max_pool')
    assert jnp.allclose(out1, ref1, atol=1e-6, rtol=1e-6), "single-level max mismatch"
    out1a = jax.block_until_ready(spp_layer(x, 1, 'avg_pool'))
    ref1a = _reference_spp(x, 1, 'avg_pool')
    assert jnp.allclose(out1a, ref1a, atol=1e-5, rtol=1e-5), "single-level avg mismatch"

    # Non-power-of-two spatial size exercises the implicit-padding (clipped-bin) path
    # for both pooling modes; the pyramid still composes hierarchically here.
    x2 = jax.random.normal(jax.random.PRNGKey(1), (2, 4, 13, 13), dtype=jnp.float32)
    for pt, tol in (('max_pool', 1e-6), ('avg_pool', 1e-5)):
        o = jax.block_until_ready(spp_layer(x2, 3, pt))
        r = _reference_spp(x2, 3, pt)
        assert jnp.allclose(o, r, atol=tol, rtol=tol), f"padded {pt} mismatch"

    print("KERNEL_OK")
</pallas_src>

<mosaic_0001>
module attributes {stable_mosaic.version = 11 : i64} {
  func.func @kernel(%arg0: i32, %arg1: i32, %arg2: memref<1x4x16x16xf32, #tpu.memory_space<vmem>>, %arg3: memref<1x4x1x1xf32, #tpu.memory_space<vmem>>, %arg4: memref<1x4x2x2xf32, #tpu.memory_space<vmem>>, %arg5: memref<1x4x4x4xf32, #tpu.memory_space<vmem>>) attributes {dimension_semantics = [#tpu.dimension_semantics<parallel>, #tpu.dimension_semantics<parallel>], iteration_bounds = array<i64: 2, 1>, scalar_prefetch = 0 : i64, scratch_operands = 0 : i64, tpu.core_type = #tpu.core_type<tc>, window_params = [{transform_indices = @transform_0, window_bounds = array<i64: 1, 4, 16, 16>}, {transform_indices = @transform_1, window_bounds = array<i64: 1, 4, 1, 1>}, {transform_indices = @transform_2, window_bounds = array<i64: 1, 4, 2, 2>}, {transform_indices = @transform_3, window_bounds = array<i64: 1, 4, 4, 4>}]} {
    %c0 = arith.constant 0 : index
    %c0_0 = arith.constant 0 : index
    %c0_1 = arith.constant 0 : index
    %c0_2 = arith.constant 0 : index
    %0 = vector.load %arg2[%c0, %c0_0, %c0_1, %c0_2] : memref<1x4x16x16xf32, #tpu.memory_space<vmem>>, vector<1x4x4x16xf32>
    %1 = vector.shape_cast %0 : vector<1x4x4x16xf32> to vector<4x4x16xf32>
    %cst = arith.constant dense<0xFF800000> : vector<4x16xf32>
    %2 = vector.multi_reduction <maximumf>, %1, %cst [1] : vector<4x4x16xf32> to vector<4x16xf32>
    %3 = vector.extract_strided_slice %2 {offsets = [0, 0], sizes = [4, 4], strides = [1, 1]} : vector<4x16xf32> to vector<4x4xf32>
    %cst_3 = arith.constant dense<0xFF800000> : vector<4xf32>
    %4 = vector.multi_reduction <maximumf>, %3, %cst_3 [1] : vector<4x4xf32> to vector<4xf32>
    %5 = vector.shape_cast %4 : vector<4xf32> to vector<4x1xf32>
    %6 = vector.extract_strided_slice %2 {offsets = [0, 4], sizes = [4, 4], strides = [1, 1]} : vector<4x16xf32> to vector<4x4xf32>
    %cst_4 = arith.constant dense<0xFF800000> : vector<4xf32>
    %7 = vector.multi_reduction <maximumf>, %6, %cst_4 [1] : vector<4x4xf32> to vector<4xf32>
    %8 = vector.shape_cast %7 : vector<4xf32> to vector<4x1xf32>
    %9 = vector.extract_strided_slice %2 {offsets = [0, 8], sizes = [4, 4], strides = [1, 1]} : vector<4x16xf32> to vector<4x4xf32>
    %cst_5 = arith.constant dense<0xFF800000> : vector<4xf32>
    %10 = vector.multi_reduction <maximumf>, %9, %cst_5 [1] : vector<4x4xf32> to vector<4xf32>
    %11 = vector.shape_cast %10 : vector<4xf32> to vector<4x1xf32>
    %12 = vector.extract_strided_slice %2 {offsets = [0, 12], sizes = [4, 4], strides = [1, 1]} : vector<4x16xf32> to vector<4x4xf32>
    %cst_6 = arith.constant dense<0xFF800000> : vector<4xf32>
    %13 = vector.multi_reduction <maximumf>, %12, %cst_6 [1] : vector<4x4xf32> to vector<4xf32>
    %14 = vector.shape_cast %13 : vector<4xf32> to vector<4x1xf32>
    %c0_7 = arith.constant 0 : index
    %c0_8 = arith.constant 0 : index
    %c4 = arith.constant 4 : index
    %c0_9 = arith.constant 0 : index
    %15 = vector.load %arg2[%c0_7, %c0_8, %c4, %c0_9] : memref<1x4x16x16xf32, #tpu.memory_space<vmem>>, vector<1x4x4x16xf32>
    %16 = vector.shape_cast %15 : vector<1x4x4x16xf32> to vector<4x4x16xf32>
    %cst_10 = arith.constant dense<0xFF800000> : vector<4x16xf32>
    %17 = vector.multi_reduction <maximumf>, %16, %cst_10 [1] : vector<4x4x16xf32> to vector<4x16xf32>
    %18 = vector.extract_strided_slice %17 {offsets = [0, 0], sizes = [4, 4], strides = [1, 1]} : vector<4x16xf32> to vector<4x4xf32>
    %cst_11 = arith.constant dense<0xFF800000> : vector<4xf32>
    %19 = vector.multi_reduction <maximumf>, %18, %cst_11 [1] : vector<4x4xf32> to vector<4xf32>
    %20 = vector.shape_cast %19 : vector<4xf32> to vector<4x1xf32>
    %21 = vector.extract_strided_slice %17 {offsets = [0, 4], sizes = [4, 4], strides = [1, 1]} : vector<4x16xf32> to vector<4x4xf32>
    %cst_12 = arith.constant dense<0xFF800000> : vector<4xf32>
    %22 = vector.multi_reduction <maximumf>, %21, %cst_12 [1] : vector<4x4xf32> to vector<4xf32>
    %23 = vector.shape_cast %22 : vector<4xf32> to vector<4x1xf32>
    %24 = vector.extract_strided_slice %17 {offsets = [0, 8], sizes = [4, 4], strides = [1, 1]} : vector<4x16xf32> to vector<4x4xf32>
    %cst_13 = arith.constant dense<0xFF800000> : vector<4xf32>
    %25 = vector.multi_reduction <maximumf>, %24, %cst_13 [1] : vector<4x4xf32> to vector<4xf32>
    %26 = vector.shape_cast %25 : vector<4xf32> to vector<4x1xf32>
    %27 = vector.extract_strided_slice %17 {offsets = [0, 12], sizes = [4, 4], strides = [1, 1]} : vector<4x16xf32> to vector<4x4xf32>
    %cst_14 = arith.constant dense<0xFF800000> : vector<4xf32>
    %28 = vector.multi_reduction <maximumf>, %27, %cst_14 [1] : vector<4x4xf32> to vector<4xf32>
    %29 = vector.shape_cast %28 : vector<4xf32> to vector<4x1xf32>
    %c0_15 = arith.constant 0 : index
    %c0_16 = arith.constant 0 : index
    %c8 = arith.constant 8 : index
    %c0_17 = arith.constant 0 : index
    %30 = vector.load %arg2[%c0_15, %c0_16, %c8, %c0_17] : memref<1x4x16x16xf32, #tpu.memory_space<vmem>>, vector<1x4x4x16xf32>
    %31 = vector.shape_cast %30 : vector<1x4x4x16xf32> to vector<4x4x16xf32>
    %cst_18 = arith.constant dense<0xFF800000> : vector<4x16xf32>
    %32 = vector.multi_reduction <maximumf>, %31, %cst_18 [1] : vector<4x4x16xf32> to vector<4x16xf32>
    %33 = vector.extract_strided_slice %32 {offsets = [0, 0], sizes = [4, 4], strides = [1, 1]} : vector<4x16xf32> to vector<4x4xf32>
    %cst_19 = arith.constant dense<0xFF800000> : vector<4xf32>
    %34 = vector.multi_reduction <maximumf>, %33, %cst_19 [1] : vector<4x4xf32> to vector<4xf32>
    %35 = vector.shape_cast %34 : vector<4xf32> to vector<4x1xf32>
    %36 = vector.extract_strided_slice %32 {offsets = [0, 4], sizes = [4, 4], strides = [1, 1]} : vector<4x16xf32> to vector<4x4xf32>
    %cst_20 = arith.constant dense<0xFF800000> : vector<4xf32>
    %37 = vector.multi_reduction <maximumf>, %36, %cst_20 [1] : vector<4x4xf32> to vector<4xf32>
    %38 = vector.shape_cast %37 : vector<4xf32> to vector<4x1xf32>
    %39 = vector.extract_strided_slice %32 {offsets = [0, 8], sizes = [4, 4], strides = [1, 1]} : vector<4x16xf32> to vector<4x4xf32>
    %cst_21 = arith.constant dense<0xFF800000> : vector<4xf32>
    %40 = vector.multi_reduction <maximumf>, %39, %cst_21 [1] : vector<4x4xf32> to vector<4xf32>
    %41 = vector.shape_cast %40 : vector<4xf32> to vector<4x1xf32>
    %42 = vector.extract_strided_slice %32 {offsets = [0, 12], sizes = [4, 4], strides = [1, 1]} : vector<4x16xf32> to vector<4x4xf32>
    %cst_22 = arith.constant dense<0xFF800000> : vector<4xf32>
    %43 = vector.multi_reduction <maximumf>, %42, %cst_22 [1] : vector<4x4xf32> to vector<4xf32>
    %44 = vector.shape_cast %43 : vector<4xf32> to vector<4x1xf32>
    %c0_23 = arith.constant 0 : index
    %c0_24 = arith.constant 0 : index
    %c12 = arith.constant 12 : index
    %c0_25 = arith.constant 0 : index
    %45 = vector.load %arg2[%c0_23, %c0_24, %c12, %c0_25] : memref<1x4x16x16xf32, #tpu.memory_space<vmem>>, vector<1x4x4x16xf32>
    %46 = vector.shape_cast %45 : vector<1x4x4x16xf32> to vector<4x4x16xf32>
    %cst_26 = arith.constant dense<0xFF800000> : vector<4x16xf32>
    %47 = vector.multi_reduction <maximumf>, %46, %cst_26 [1] : vector<4x4x16xf32> to vector<4x16xf32>
    %48 = vector.extract_strided_slice %47 {offsets = [0, 0], sizes = [4, 4], strides = [1, 1]} : vector<4x16xf32> to vector<4x4xf32>
    %cst_27 = arith.constant dense<0xFF800000> : vector<4xf32>
    %49 = vector.multi_reduction <maximumf>, %48, %cst_27 [1] : vector<4x4xf32> to vector<4xf32>
    %50 = vector.shape_cast %49 : vector<4xf32> to vector<4x1xf32>
    %51 = vector.extract_strided_slice %47 {offsets = [0, 4], sizes = [4, 4], strides = [1, 1]} : vector<4x16xf32> to vector<4x4xf32>
    %cst_28 = arith.constant dense<0xFF800000> : vector<4xf32>
    %52 = vector.multi_reduction <maximumf>, %51, %cst_28 [1] : vector<4x4xf32> to vector<4xf32>
    %53 = vector.shape_cast %52 : vector<4xf32> to vector<4x1xf32>
    %54 = vector.extract_strided_slice %47 {offsets = [0, 8], sizes = [4, 4], strides = [1, 1]} : vector<4x16xf32> to vector<4x4xf32>
    %cst_29 = arith.constant dense<0xFF800000> : vector<4xf32>
    %55 = vector.multi_reduction <maximumf>, %54, %cst_29 [1] : vector<4x4xf32> to vector<4xf32>
    %56 = vector.shape_cast %55 : vector<4xf32> to vector<4x1xf32>
    %57 = vector.extract_strided_slice %47 {offsets = [0, 12], sizes = [4, 4], strides = [1, 1]} : vector<4x16xf32> to vector<4x4xf32>
    %cst_30 = arith.constant dense<0xFF800000> : vector<4xf32>
    %58 = vector.multi_reduction <maximumf>, %57, %cst_30 [1] : vector<4x4xf32> to vector<4xf32>
    %59 = vector.shape_cast %58 : vector<4xf32> to vector<4x1xf32>
    %60 = tpu.concatenate %5, %8, %11, %14 in 1 : vector<4x1xf32>, vector<4x1xf32>, vector<4x1xf32>, vector<4x1xf32> -> vector<4x4xf32>
    %61 = vector.shape_cast %60 : vector<4x4xf32> to vector<4x1x4xf32>
    %62 = tpu.concatenate %20, %23, %26, %29 in 1 : vector<4x1xf32>, vector<4x1xf32>, vector<4x1xf32>, vector<4x1xf32> -> vector<4x4xf32>
    %63 = vector.shape_cast %62 : vector<4x4xf32> to vector<4x1x4xf32>
    %64 = tpu.concatenate %35, %38, %41, %44 in 1 : vector<4x1xf32>, vector<4x1xf32>, vector<4x1xf32>, vector<4x1xf32> -> vector<4x4xf32>
    %65 = vector.shape_cast %64 : vector<4x4xf32> to vector<4x1x4xf32>
    %66 = tpu.concatenate %50, %53, %56, %59 in 1 : vector<4x1xf32>, vector<4x1xf32>, vector<4x1xf32>, vector<4x1xf32> -> vector<4x4xf32>
    %67 = vector.shape_cast %66 : vector<4x4xf32> to vector<4x1x4xf32>
    %68 = tpu.concatenate %61, %63, %65, %67 in 1 : vector<4x1x4xf32>, vector<4x1x4xf32>, vector<4x1x4xf32>, vector<4x1x4xf32> -> vector<4x4x4xf32>
    %c0_31 = arith.constant 0 : index
    %c0_32 = arith.constant 0 : index
    %c0_33 = arith.constant 0 : index
    %c0_34 = arith.constant 0 : index
    %69 = vector.load %arg5[%c0_31, %c0_32, %c0_33, %c0_34] : memref<1x4x4x4xf32, #tpu.memory_space<vmem>>, vector<1x4x4x4xf32>
    %70 = vector.shape_cast %69 : vector<1x4x4x4xf32> to vector<4x4x4xf32>
    %71 = vector.shape_cast %68 : vector<4x4x4xf32> to vector<1x4x4x4xf32>
    tpu.vector_store %arg5[%c0_31, %c0_32, %c0_33, %c0_34], %71 {strides = array<i32>} : memref<1x4x4x4xf32, #tpu.memory_space<vmem>>, vector<1x4x4x4xf32>,
    %72 = arith.maximumf %5, %8 : vector<4x1xf32>
    %73 = arith.maximumf %20, %23 : vector<4x1xf32>
    %74 = arith.maximumf %72, %73 : vector<4x1xf32>
    %75 = arith.maximumf %11, %14 : vector<4x1xf32>
    %76 = arith.maximumf %26, %29 : vector<4x1xf32>
    %77 = arith.maximumf %75, %76 : vector<4x1xf32>
    %78 = arith.maximumf %35, %38 : vector<4x1xf32>
    %79 = arith.maximumf %50, %53 : vector<4x1xf32>
    %80 = arith.maximumf %78, %79 : vector<4x1xf32>
    %81 = arith.maximumf %41, %44 : vector<4x1xf32>
    %82 = arith.maximumf %56, %59 : vector<4x1xf32>
    %83 = arith.maximumf %81, %82 : vector<4x1xf32>
    %84 = tpu.concatenate %74, %77 in 1 : vector<4x1xf32>, vector<4x1xf32> -> vector<4x2xf32>
    %85 = vector.shape_cast %84 : vector<4x2xf32> to vector<4x1x2xf32>
    %86 = tpu.concatenate %80, %83 in 1 : vector<4x1xf32>, vector<4x1xf32> -> vector<4x2xf32>
    %87 = vector.shape_cast %86 : vector<4x2xf32> to vector<4x1x2xf32>
    %88 = tpu.concatenate %85, %87 in 1 : vector<4x1x2xf32>, vector<4x1x2xf32> -> vector<4x2x2xf32>
    %c0_35 = arith.constant 0 : index
    %c0_36 = arith.constant 0 : index
    %c0_37 = arith.constant 0 : index
    %c0_38 = arith.constant 0 : index
    %89 = vector.load %arg4[%c0_35, %c0_36, %c0_37, %c0_38] : memref<1x4x2x2xf32, #tpu.memory_space<vmem>>, vector<1x4x2x2xf32>
    %90 = vector.shape_cast %89 : vector<1x4x2x2xf32> to vector<4x2x2xf32>
    %91 = vector.shape_cast %88 : vector<4x2x2xf32> to vector<1x4x2x2xf32>
    tpu.vector_store %arg4[%c0_35, %c0_36, %c0_37, %c0_38], %91 {strides = array<i32>} : memref<1x4x2x2xf32, #tpu.memory_space<vmem>>, vector<1x4x2x2xf32>,
    %92 = arith.maximumf %74, %77 : vector<4x1xf32>
    %93 = arith.maximumf %80, %83 : vector<4x1xf32>
    %94 = arith.maximumf %92, %93 : vector<4x1xf32>
    %95 = vector.shape_cast %94 : vector<4x1xf32> to vector<4x1x1xf32>
    %c0_39 = arith.constant 0 : index
    %c0_40 = arith.constant 0 : index
    %c0_41 = arith.constant 0 : index
    %c0_42 = arith.constant 0 : index
    %96 = vector.load %arg3[%c0_39, %c0_40, %c0_41, %c0_42] : memref<1x4x1x1xf32, #tpu.memory_space<vmem>>, vector<1x4x1x1xf32>
    %97 = vector.shape_cast %96 : vector<1x4x1x1xf32> to vector<4x1x1xf32>
    %98 = vector.shape_cast %95 : vector<4x1x1xf32> to vector<1x4x1x1xf32>
    tpu.vector_store %arg3[%c0_39, %c0_40, %c0_41, %c0_42], %98 {strides = array<i32>} : memref<1x4x1x1xf32, #tpu.memory_space<vmem>>, vector<1x4x1x1xf32>,
    return
  }
  func.func @transform_0(%arg0: i32, %arg1: i32) -> (i32, i32, i32, i32) {
    %c0_i32 = arith.constant 0 : i32
    %c0_i32_0 = arith.constant 0 : i32
    %c0_i32_1 = arith.constant 0 : i32
    return %arg0, %arg1, %c0_i32, %c0_i32_0 : i32, i32, i32, i32
  }
  func.func @transform_1(%arg0: i32, %arg1: i32) -> (i32, i32, i32, i32) {
    %c0_i32 = arith.constant 0 : i32
    %c0_i32_0 = arith.constant 0 : i32
    %c0_i32_1 = arith.constant 0 : i32
    return %arg0, %arg1, %c0_i32, %c0_i32_0 : i32, i32, i32, i32
  }
  func.func @transform_2(%arg0: i32, %arg1: i32) -> (i32, i32, i32, i32) {
    %c0_i32 = arith.constant 0 : i32
    %c0_i32_0 = arith.constant 0 : i32
    %c0_i32_1 = arith.constant 0 : i32
    return %arg0, %arg1, %c0_i32, %c0_i32_0 : i32, i32, i32, i32
  }
  func.func @transform_3(%arg0: i32, %arg1: i32) -> (i32, i32, i32, i32) {
    %c0_i32 = arith.constant 0 : i32
    %c0_i32_0 = arith.constant 0 : i32
    %c0_i32_1 = arith.constant 0 : i32
    return %arg0, %arg1, %c0_i32, %c0_i32_0 : i32, i32, i32, i32
  }
}

</mosaic_0001>

<bundles_post_ra>
// kernel: tpu_custom_call.1
= control target key start
LH: loop header
LB: loop body
LE: loop exit
PB: predicated region body
PF: predicated region fallthrough
CT: control target
= control target key end

     0   :  { %9 = vsyncpa [#allocation3], 0  ;;  %s1618_s0 = inlined_call_operand.hbm [shape: f32[2,4,16,16], index: 0, kind: input, shape index: {}]   ;;  %s1619_s1 = inlined_call_operand.vmem [shape: f32[2,4,1,1], index: 1, kind: output, shape index: {0}]   ;;  %s1620_s2 = inlined_call_operand.vmem [shape: f32[2,4,2,2], index: 2, kind: output, shape index: {1}]   ;;  %s1621_s3 = inlined_call_operand.hbm [shape: f32[2,4,4,4], index: 3, kind: output, shape index: {2}]  }
   0x1   :  { %11 = vsyncpa [#allocation3 + $0x1], 0 }
   0x2   :  { %12 = vsyncpa [#allocation4], 0 }
   0x3   :  { %14 = vsyncpa [#allocation4 + $0x1], 0  ;;  %s1217_s12 = smov 0   ;;  %s1219_s13 = smov 0  }
   0x4   :  { %s1221_s14 = smov 0   ;;  %s1223_s15 = smov 0  }
   0x5   :  { %s1225_s16 = smov 0   ;;  %s1227_s17 = smov 0  }
   0x6 LB: > { %s992_s18 = sadd.s32 4294967295, %s1188_s17   ;;  %s993_s19 = sadd.s32 4294967294, %s1188_s17   ;;  %s1188_s17 = sphi %s1227_s17, %s20_s17   ;;  %s1184_s16 = sphi %s1225_s16, %s1632_s16   ;;  %s1180_s15 = sphi %s1223_s15, %s1631_s15   ;;  %s1176_s14 = sphi %s1221_s14, %s1630_s14   ;;  %s1172_s13 = sphi %s1219_s13, %s1629_s13   ;;  %s1168_s12 = sphi %s1217_s12, %s1628_s12  }
   0x7   : > { %s32_s20 = sadd.s32 1, %s1184_s16  ;;  %s41_s21 = sadd.s32 1, %s1176_s14 }
   0x8   : > { %p34_p0 = scmp.ge.s32.totalorder %s32_s20, 2  ;;  %p48_p1 = scmp.ne.s32.totalorder %s1176_s14, %s1172_s13 }
   0x9   : > { %p49_p2 = scmp.eq.s32.totalorder %s1188_s17, 0  ;;  %p54_p3 = scmp.ne.s32.totalorder %s1172_s13, %s1168_s12 }
   0xa   : > { %s1634_s20 = smov (%p34_p0, %s32_s20), 0  ;;  %p55_p5 = scmp.eq.s32.totalorder %s992_s18, 0 }
   0xb   : > { %p1258_p4 = por %p49_p2, %p48_p1  ;;  %s36_s23 = ssub.s32 %s1184_s16, %s1634_s20 }
   0xc   : > { %p136_p6 = scmp.eq.s32.totalorder %s992_s18, 1  ;;  %p39_p7 = scmp.eq.s32.totalorder %s36_s23, 0 }
   0xd   : > { %p1264_p8 = por %p55_p5, %p54_p3  ;;  %p142_p10 = scmp.eq.s32.totalorder %s993_s19, 1 }
   0xe   : > { %p1268_p9 = por %p136_p6, %p48_p1  ;;  %p1025_p13 = scmp.lt.s32.totalorder %s1188_s17, 2 }
   0xf   : > { %s1273_s26 = scalar_select %p39_p7, %s1176_s14, %s41_s21  }
  0x10   : > { %p1275_p11 = por %p142_p10, %p54_p3  ;;  %s162_s28 = sand.u32 1, %s1176_s14  }
  0x11   : > { %s996_s29 = sshll.u32 %s162_s28, 6  ;;  %s1010_s30 = sshll.u32 %s1184_s16, 10 }
  0x12   : > { %s175_s6 = scalar_lea.hbm %s1618_s0, %s1010_s30  ;;  %s166_s7 = scalar_lea.vmem [#allocation2], %s996_s29 }
  0x13   : > { %s176_s8 = sshll.u32 %s166_s7, 4  ;;  %p1288_p0 = pnand %p1025_p13, %p1258_p4  ;;  %s177_s8 = int_to_ptr.vmem [resolvable:$true] %s176_s8 }
  0x14   : > { %p999_p1 = scmp.ge.s32.totalorder %s1188_s17, 1  ;;  %s163_s10 = scalar_lea.sflag [#allocation3], %s162_s28 }
  0x15   : > { %p1082_p2 = pneg %p1288_p0  ;;  %s1093_s11 = scalar_lea.vmem %s177_s8, 1024 }
  0x16   : > { %p1094_p3 = scmp.ne.s32.totalorder %s177_s8, %s1093_s11  ;;  %s1190_s18 = smov [#allocation2]  }
  0x17   : > { %s1098_s19 = sshll.u32 %s1190_s18, 4  ;;  %s1099_s19 = int_to_ptr.vmem [resolvable:$false] %s1098_s19 }
  0x18   : > { %p1096_p5 = pnand %p1094_p3, %p1082_p2  ;;  %s1100_s21 = scalar_lea.vmem %s1099_s19, 2048 }
  0x19   : > { %p1101_p7 = scmp.lt.s32.totalorder %s177_s8, %s1099_s19  ;;  %p1102_p10 = scmp.lt.s32.totalorder %s1100_s21, %s1093_s11 }
  0x1a   : > { %p1097_p6 = pneg %p1096_p5 }
  0x1b   : > { %p1103_p12 = por %p1102_p10, %p1101_p7 }
  0x1d   : > { %p1104_p4 = pnand %p1103_p12, %p1097_p6 }
  0x1f   : > { %1107 = shalt.err (!%p1104_p4)
}
  0x20   : > { %s1191_s22 = smov 128   ;;  %s1192_s23 = smov 8  }
  0x21   : > { %1020 = dma.hbm_to_vmem [thread:$0]  (!%p1288_p0), %s175_s6, 1024, %s177_s8, %s163_s10, %s1191_s22, %s1191_s22, %s1192_s23  }
  0x22   : > { %p184_p13 = scmp.lt.s32.totalorder %s1188_s17, 3 }
  0x24   : > { %p185_p2 = pnand %p999_p1, %p184_p13 }
  0x25   : > { %s1301_s28 = sand.u32 (!%p185_p2), 1, %s1172_s13  }
  0x26   : > { %188 = sbr.rel (%p185_p2) target bundleno = 265 (0x109), region = 24  ;;  %s1000_s29 = sshll.u32 (!%p185_p2), %s1301_s28, 6 }
  0x27   : > { %s191_s30 = scalar_lea.sflag (!%p185_p2), [#allocation3], %s1301_s28  ;;  %s1305_s4 = scalar_lea.vmem (!%p185_p2), [#allocation2], %s1000_s29 }
  0x2b   : > { %1159 = dma.done.wait (%p1264_p8), %s191_s30, 1024  }
  0x2c   : > { %1161 = vsyncadd (%p1264_p8), %s191_s30, 4294966272  ;;  %vm259_vm0 = vcmask 125952   ;;  %v315_v0 = vld [vmem:[%s1305_s4 + $0x4] sm:$0xf]  ;;  %v316_v1 = vld [vmem:[%s1305_s4 + $0x14] sm:$0xf] }
  0x2d   : > { %v317_v2 = vld [vmem:[%s1305_s4 + $0x24] sm:$0xf]  ;;  %v318_v3 = vld [vmem:[%s1305_s4 + $0x34] sm:$0xf]  ;;  %v319_v4 = vsel %vm259_vm0, %v315_v0, -inf  ;;  %v326_v5 = vsel %vm259_vm0, %v316_v1, -inf }
  0x2e   : > { %v333_v6 = vsel %vm259_vm0, %v317_v2, -inf  ;;  %v320_v7 = vrot.slane %v319_v4, 4  ;;  %v327_v8 = vrot.slane %v326_v5, 4  ;;  %v340_v10 = vsel %vm259_vm0, %v318_v3, -inf  ;;  %v367_v11 = vld [vmem:[%s1305_s4 + $0x8] sm:$0xf] }
  0x2f   : > { %v334_v9 = vrot.slane %v333_v6, 4  ;;  %vm292_vm1 = vcmask 1041409   ;;  %v341_v12 = vrot.slane %v340_v10, 4  ;;  %v368_v13 = vld [vmem:[%s1305_s4 + $0x18] sm:$0xf]  ;;  %v371_v15 = vsel %vm259_vm0, %v367_v11, -inf }
  0x30   : > { %v369_v14 = vld [vmem:[%s1305_s4 + $0x28] sm:$0xf]  ;;  %vm294_vm2 = vcmask 1042434   ;;  %v321_v16 = vmax.f32 %v319_v4, %v320_v7  ;;  %v328_v17 = vmax.f32 %v326_v5, %v327_v8  ;;  %v370_v19 = vld [vmem:[%s1305_s4 + $0x38] sm:$0xf]  ;;  %v372_v20 = vrot.slane %v371_v15, 4 }
  0x31   : > { %v335_v18 = vmax.f32 %v333_v6, %v334_v9  ;;  %vm296_vm3 = vcmask 1043459   ;;  %v342_v21 = vmax.f32 %v340_v10, %v341_v12  ;;  %v378_v22 = vsel %vm259_vm0, %v368_v13, -inf  ;;  %v419_v45 = vld [vmem:[%s1305_s4 + $0xc] sm:$0xf]  ;;  %v420_v50 = vld [vmem:[%s1305_s4 + $0x1c] sm:$0xf] }
  0x32   : > { %v385_v23 = vsel %vm259_vm0, %v369_v14, -inf  ;;  %v392_v24 = vsel %vm259_vm0, %v370_v19, -inf  ;;  %vm307_vm4 = vcmask 93248   ;;  %v322_v25 = vrot.slane %v321_v16, 2  ;;  %v421_v59 = vld [vmem:[%s1305_s4 + $0x2c] sm:$0xf] }
  0x33   : > { %v329_v26 = vrot.slane %v328_v17, 2  ;;  %v336_v27 = vrot.slane %v335_v18, 2  ;;  %vm299_vm5 = vcmask 27648   ;;  %v373_v28 = vmax.f32 %v371_v15, %v372_v20  ;;  %v422_v4 = vld [vmem:[%s1305_s4 + $0x3c] sm:$0xf]  ;;  %p236_p8 = scmp.lt.s32.totalorder %s1180_s15, 1 }
  0x34   : > { %v343_v29 = vrot.slane %v342_v21, 2  ;;  %v379_v30 = vrot.slane %v378_v22, 4  ;;  %v386_v31 = vrot.slane %v385_v23, 4  ;;  %v393_v32 = vrot.slane %v392_v24, 4  ;;  %v255_v9 = vld [vmem:[%s1305_s4] sm:$0xf] }
  0x35   : > { %vm303_vm6 = vcmask 60448   ;;  %v323_v33 = vmax.f32 %v321_v16, %v322_v25  ;;  %v330_v34 = vmax.f32 %v328_v17, %v329_v26  ;;  %v337_v35 = vmax.f32 %v335_v18, %v336_v27  ;;  %v256_v18 = vld [vmem:[%s1305_s4 + $0x10] sm:$0xf]  ;;  %s1472_s24 = scalar_select %p236_p8, %s1180_s15, 1 }
  0x36   : > { %v374_v36 = vrot.slane %v373_v28, 2  ;;  %v344_v37 = vmax.f32 %v342_v21, %v343_v29  ;;  %v380_v38 = vmax.f32 %v378_v22, %v379_v30  ;;  %v387_v39 = vmax.f32 %v385_v23, %v386_v31  ;;  %v257_v29 = vld [vmem:[%s1305_s4 + $0x20] sm:$0xf]  ;;  %s1001_s5 = sshll.u32 %s1301_s28, 4  ;;  %s1012_s8 = sshll.u32 %s1180_s15, 8 }
  0x37   : > { %v394_v40 = vmax.f32 %v392_v24, %v393_v32  ;;  %v324_v41 = vrot.slane %v323_v33, 1  ;;  %v331_v42 = vrot.slane %v330_v34, 1  ;;  %v338_v43 = vrot.slane %v337_v35, 1  ;;  %s1002_s6 = sshll.u32 %s1472_s24, 2  ;;  %s1011_s7 = sshll.u32 %s1472_s24, 3 }
  0x38   : > { %v375_v44 = vmax.f32 %v373_v28, %v374_v36  ;;  %v345_v46 = vrot.slane %v344_v37, 1  ;;  %v381_v47 = vrot.slane %v380_v38, 2  ;;  %v388_v48 = vrot.slane %v387_v39, 2  ;;  %s1499_s9 = scalar_lea.vmem [#allocation5], %s1001_s5  ;;  %s1505_s19 = scalar_lea.vmem %s1619_s1, %s1002_s6 }
  0x39   : > { %v395_v49 = vrot.slane %v394_v40, 2  ;;  %v325_v51 = vmax.f32 %v323_v33, %v324_v41  ;;  %v332_v52 = vmax.f32 %v330_v34, %v331_v42  ;;  %v339_v53 = vmax.f32 %v337_v35, %v338_v43  ;;  %s836_s10 = sshll.u32 %s1499_s9, 4  ;;  %s1513_s22 = scalar_lea.vmem %s1620_s2, %s1011_s7  ;;  %s1533_s10 = int_to_ptr.vmem [resolvable:$true] %s836_s10 }
  0x3a   : > { %v376_v54 = vrot.slane %v375_v44, 1  ;;  %vm311_vm7 = vcmask 126048   ;;  %v346_v55 = vmax.f32 %v344_v37, %v345_v46  ;;  %v382_v56 = vmax.f32 %v380_v38, %v381_v47  ;;  %s1531_s30 = scalar_lea.hbm %s1621_s3, %s1012_s8  ;;  %s1108_s24 = scalar_lea.vmem %s1533_s10, 256 }
  0x3b   : > { %v389_v57 = vmax.f32 %v387_v39, %v388_v48  ;;  %v396_v58 = vmax.f32 %v394_v40, %v395_v49  ;;  %v351_v60 = vsel %vm292_vm1, %v332_v52, %v325_v51  ;;  %v423_v62 = vsel %vm259_vm0, %v419_v45, -inf  ;;  %v258_v40 = vld [vmem:[%s1305_s4 + $0x30] sm:$0xf]  ;;  %s813_s4 = scalar_lea.sflag [#allocation4], %s1301_s28  ;;  %p1109_p12 = scmp.ne.s32.totalorder %s1533_s10, %s1108_s24 }
  0x3c   : > { %v377_v61 = vmax.f32 %v375_v44, %v376_v54  ;;  %v430_v63 = vsel %vm259_vm0, %v420_v50, -inf  ;;  %v352_v0 = vsel %vm294_vm2, %v339_v53, %v351_v60  ;;  %v383_v1 = vrot.slane %v382_v56, 1  ;;  %s1194_s5 = smov [#allocation5]  }
  0x3d   : > { %v390_v2 = vrot.slane %v389_v57, 1  ;;  %v397_v3 = vrot.slane %v396_v58, 1  ;;  %v1336_v5 = vsel %vm296_vm3, %v346_v55, %v352_v0  ;;  %v424_v6 = vrot.slane %v423_v62, 4  ;;  %p1110_p0 = pnand %p1109_p12, %p1268_p9  ;;  %s1112_s6 = sshll.u32 %s1194_s5, 4  ;;  %s1113_s6 = int_to_ptr.vmem [resolvable:$false] %s1112_s6 }
  0x3e   : > { %v431_v7 = vrot.slane %v430_v63, 4  ;;  %v437_v8 = vsel %vm259_vm0, %v421_v59, -inf  ;;  %v361_v10 = vsel %vm307_vm4, %v1336_v5, -inf  ;;  %v355_v11 = vsel %vm299_vm5, %v1336_v5, -inf  ;;  %s1114_s7 = scalar_lea.vmem %s1113_s6, 512  ;;  %p1115_p3 = scmp.lt.s32.totalorder %s1533_s10, %s1113_s6 }
  0x3f   : > { %v384_v12 = vmax.f32 %v382_v56, %v383_v1  ;;  %v391_v13 = vmax.f32 %v389_v57, %v390_v2  ;;  %362 = vmax.xlane.f32.xlu1 %v361_v10  ;;  %356 = vmax.xlane.f32.xlu0 %v355_v11  ;;  %v398_v14 = vmax.f32 %v396_v58, %v397_v3  ;;  %v358_v15 = vsel %vm303_vm6, %v1336_v5, -inf  ;;  %p1111_p1 = pneg %p1110_p0  ;;  %p1116_p5 = scmp.lt.s32.totalorder %s1114_s7, %s1108_s24 }
  0x40   : > { %v425_v16 = vmax.f32 %v423_v62, %v424_v6  ;;  %v432_v17 = vmax.f32 %v430_v63, %v431_v7  ;;  %v438_v20 = vrot.slane %v437_v8, 4  ;;  %v444_v21 = vsel %vm259_vm0, %v422_v4, -inf }
  0x41   : > { %v403_v19 = vsel %vm292_vm1, %v384_v12, %v377_v61  ;;  %v260_v22 = vsel %vm259_vm0, %v255_v9, -inf  ;;  %v445_v26 = vrot.slane %v444_v21, 4  ;;  %v267_v31 = vsel %vm259_vm0, %v256_v18, -inf  ;;  %p1117_p6 = por %p1116_p5, %p1115_p3 }
  0x42   : > { %v404_v23 = vsel %vm294_vm2, %v391_v13, %v403_v19  ;;  %v426_v24 = vrot.slane %v425_v16, 2  ;;  %v433_v25 = vrot.slane %v432_v17, 2  ;;  %v439_v28 = vmax.f32 %v437_v8, %v438_v20 }
  0x43   : > { %v405_v27 = vsel %vm296_vm3, %v398_v14, %v404_v23  ;;  %v261_v30 = vrot.slane %v260_v22, 4  ;;  %359 = vmax.xlane.f32.xlu0 %v358_v15  ;;  %v446_v38 = vmax.f32 %v444_v21, %v445_v26  ;;  %v268_v43 = vrot.slane %v267_v31, 4  ;;  %p1118_p7 = pnand %p1117_p6, %p1111_p1 }
  0x44   : > { %v407_v32 = vsel %vm299_vm5, %v405_v27, -inf  ;;  %v413_v33 = vsel %vm307_vm4, %v405_v27, -inf  ;;  %v410_v34 = vsel %vm303_vm6, %v405_v27, -inf  ;;  %v427_v35 = vmax.f32 %v425_v16, %v426_v24 }
  0x45   : > { %408 = vmax.xlane.f32.xlu1 %v407_v32  ;;  %v434_v36 = vmax.f32 %v432_v17, %v433_v25  ;;  %v440_v37 = vrot.slane %v439_v28, 2  ;;  %v416_v39 = vsel %vm311_vm7, %v405_v27, -inf  ;;  %v262_v42 = vmax.f32 %v260_v22, %v261_v30 }
  0x46   : > { %v428_v41 = vrot.slane %v427_v35, 1  ;;  %v274_v44 = vsel %vm259_vm0, %v257_v29, -inf  ;;  %v447_v47 = vrot.slane %v446_v38, 2  ;;  %v269_v51 = vmax.f32 %v267_v31, %v268_v43 }
  0x47   : > { %v435_v45 = vrot.slane %v434_v36, 1  ;;  %v441_v46 = vmax.f32 %v439_v28, %v440_v37  ;;  %v275_v48 = vrot.slane %v274_v44, 4  ;;  %411 = vmax.xlane.f32.xlu0 %v410_v34  ;;  %v263_v50 = vrot.slane %v262_v42, 2 }
  0x48   : > { %v429_v49 = vmax.f32 %v427_v35, %v428_v41  ;;  %v281_v52 = vsel %vm259_vm0, %v258_v40, -inf  ;;  %v448_v55 = vmax.f32 %v446_v38, %v447_v47  ;;  %v270_v58 = vrot.slane %v269_v51, 2 }
  0x49   : > { %414 = vmax.xlane.f32.xlu1 %v413_v33  ;;  %v436_v53 = vmax.f32 %v434_v36, %v435_v45  ;;  %v442_v54 = vrot.slane %v441_v46, 1  ;;  %v276_v56 = vmax.f32 %v274_v44, %v275_v48  ;;  %v264_v57 = vmax.f32 %v262_v42, %v263_v50 }
  0x4a   : > { %v282_v59 = vrot.slane %v281_v52, 4  ;;  %v449_v61 = vrot.slane %v448_v55, 1  ;;  %v271_v1 = vmax.f32 %v269_v51, %v270_v58  ;;  %v364_v26 = vsel %vm311_vm7, %v1336_v5, -inf }
  0x4b   : > { %v443_v60 = vmax.f32 %v441_v46, %v442_v54  ;;  %v455_v62 = vsel %vm292_vm1, %v436_v53, %v429_v49  ;;  %v277_v63 = vrot.slane %v276_v56, 2  ;;  %417 = vmax.xlane.f32.xlu0 %v416_v39  ;;  %v265_v0 = vrot.slane %v264_v57, 1 }
  0x4c   : > { %v283_v2 = vmax.f32 %v281_v52, %v282_v59  ;;  %v450_v3 = vmax.f32 %v448_v55, %v449_v61  ;;  %v272_v7 = vrot.slane %v271_v1, 1  ;;  %v1193_v31 = vmov 1966171168  }
  0x4d   : > { %v456_v4 = vsel %vm294_vm2, %v443_v60, %v455_v62  ;;  %v278_v6 = vmax.f32 %v276_v56, %v277_v63  ;;  %v266_v10 = vmax.f32 %v264_v57, %v265_v0  ;;  %v479_v32 = vunpack.c.l.s4 %v1193_v31 }
  0x4e   : > { %v284_v8 = vrot.slane %v283_v2, 2  ;;  %v457_v9 = vsel %vm296_vm3, %v450_v3, %v456_v4  ;;  %v273_v14 = vmax.f32 %v271_v1, %v272_v7  ;;  %v481_v33 = vlaneseq }
  0x4f   : > { %v279_v11 = vrot.slane %v278_v6, 1  ;;  %v459_v12 = vsel %vm299_vm5, %v457_v9, -inf  ;;  %v462_v13 = vsel %vm303_vm6, %v457_v9, -inf  ;;  %v465_v17 = vsel %vm307_vm4, %v457_v9, -inf }
  0x50   : > { %460 = vmax.xlane.f32.xlu1 %v459_v12  ;;  %463 = vmax.xlane.f32.xlu0 %v462_v13  ;;  %v285_v16 = vmax.f32 %v283_v2, %v284_v8  ;;  %v468_v18 = vsel %vm311_vm7, %v457_v9, -inf  ;;  %v293_v20 = vsel %vm292_vm1, %v273_v14, %v266_v10  ;;  %v480_v36 = vunpack.c.0.s8 %v479_v32 }
  0x51   : > { %v280_v15 = vmax.f32 %v278_v6, %v279_v11  ;;  %v1383_v37 = vshrl.u32 %v481_v33, 7  ;;  %vm471_vm8 = vcmask 7168   ;;  %vm475_vm9 = vcmask 23552  }
  0x52   : > { %v286_v19 = vrot.slane %v285_v16, 1  ;;  %vm473_vm10 = vcmask 15360   ;;  %vm650_vm11 = vcmask 1040384   ;;  %vm655_vm12 = vcmask 1041408  }
  0x53   : > { %v295_v21 = vsel %vm294_vm2, %v280_v15, %v293_v20  ;;  %v1387_v40 = vsub.s32 %v480_v36, %v1383_v37  ;;  %v1410_v63 = vsub.s32 0, %v1383_v37  ;;  %v776_v9 = vsub.s32 1, %v1383_v37 }
  0x54   : > { %466 = vmax.xlane.f32.xlu1 %v465_v17  ;;  %469 = vmax.xlane.f32.xlu0 %v468_v18  ;;  %v287_v22 = vmax.f32 %v285_v16, %v286_v19  ;;  %v780_v10 = vsub.s32 2, %v1383_v37  ;;  %v784_v11 = vsub.s32 3, %v1383_v37  ;;  %vm660_vm13 = vcmask 1042432  }
  0x55   : > { %vm761_vm14 = vcmask 9216   ;;  %vm790_vm15 = vcmask 0  }
  0x56   : > { %v297_v23 = vsel %vm296_vm3, %v287_v22, %v295_v21 }
  0x57   : > { %v300_v24 = vsel %vm299_vm5, %v297_v23, -inf  ;;  %v304_v25 = vsel %vm303_vm6, %v297_v23, -inf  ;;  %v308_v27 = vsel %vm307_vm4, %v297_v23, -inf  ;;  %v312_v28 = vsel %vm311_vm7, %v297_v23, -inf }
  0x58   : > { %301 = vmax.xlane.f32.xlu1 %v300_v24  ;;  %305 = vmax.xlane.f32.xlu0 %v304_v25 }
  0x5c   : > { %365 = vmax.xlane.f32.xlu1 %v364_v26  ;;  %309 = vmax.xlane.f32.xlu0 %v308_v27 }
  0x60   : > { %313 = vmax.xlane.f32.xlu1 %v312_v28 }
  0xc8   : > { %v1377_v29 = vpop.xlane.xlu1 %362  ;;  %v1379_v30 = vpop.xlane.xlu0 %356 }
  0xcc   : > { %v1381_v34 = vpop.xlane.xlu0 %359 }
  0xcd   : > { %v506_v62 = vsel %vm471_vm8, %v1379_v30, %v1381_v34  ;;  %v670_v12 = vmax.f32 %v1379_v30, %v1381_v34 }
  0xce   : > { %v409_v35 = vpop.xlane.xlu1 %408  ;;  %v507_v15 = vsel %vm473_vm10, %v506_v62, %v1377_v29 }
  0xd0   : > { %v412_v5 = vpop.xlane.xlu0 %411 }
  0xd1   : > { %v534_v39 = vsel %vm471_vm8, %v409_v35, %v412_v5  ;;  %v675_v50 = vmax.f32 %v409_v35, %v412_v5 }
  0xd2   : > { %v415_v38 = vpop.xlane.xlu1 %414 }
  0xd3   : > { %v535_v41 = vsel %vm473_vm10, %v534_v39, %v415_v38 }
  0xd4   : > { %v418_v42 = vpop.xlane.xlu0 %417 }
  0xd5   : > { %v536_v43 = vsel %vm475_vm9, %v535_v41, %v418_v42  ;;  %v678_v55 = vmax.f32 %v415_v38, %v418_v42 }
  0xd6   : > { %v544_v44 = vrot.slane %v536_v43, %v1387_v40 }
  0xd8   : > { %v545_v47 = vcombine.high %v544_v44, %v544_v44  ;;  %v1394_v51 = vrot.slane %v544_v44, %v1387_v40 }
  0xd9   : > { %v461_v45 = vpop.xlane.xlu1 %460  ;;  %v464_v46 = vpop.xlane.xlu0 %463 }
  0xda   : > { %v562_v48 = vsel %vm471_vm8, %v461_v45, %v464_v46  ;;  %v676_v49 = vmax.f32 %v461_v45, %v464_v46  ;;  %v1397_v54 = vrot.slane %v545_v47, %v1387_v40  ;;  %v560_v0 = vcombine.high %v1394_v51, %v1394_v51 }
  0xdb   : > { %v613_v16 = vrot.slane %v1394_v51, %v1410_v63 }
  0xdc   : > { %v1401_v59 = vmax.f32 %v675_v50, %v676_v49  ;;  %v561_v3 = vcombine.high %v1397_v54, %v1397_v54  ;;  %v617_v22 = vrot.slane %v1397_v54, %v1410_v63  ;;  %v1443_v23 = vrot.slane %v560_v0, %v1410_v63 }
  0xdd   : > { %v467_v52 = vpop.xlane.xlu1 %466  ;;  %v470_v53 = vpop.xlane.xlu0 %469 }
  0xde   : > { %v563_v56 = vsel %vm473_vm10, %v562_v48, %v467_v52  ;;  %v679_v57 = vmax.f32 %v467_v52, %v470_v53  ;;  %v1446_v24 = vrot.slane %v561_v3, %v1410_v63 }
  0xdf   : > { %v564_v58 = vsel %vm475_vm9, %v563_v56, %v470_v53 }
  0xe0   : > { %v572_v60 = vrot.slane %v564_v58, %v1387_v40  ;;  %v1404_v61 = vmax.f32 %v678_v55, %v679_v57 }
  0xe1   : > { %v302_v1 = vpop.xlane.xlu1 %301  ;;  %v306_v2 = vpop.xlane.xlu0 %305 }
  0xe2   : > { %v573_v4 = vcombine.high %v572_v60, %v572_v60  ;;  %v1417_v6 = vrot.slane %v572_v60, %v1387_v40  ;;  %v711_v7 = vsel %vm471_vm8, %v1401_v59, %v1404_v61  ;;  %v669_v14 = vmax.f32 %v302_v1, %v306_v2 }
  0xe3   : > { %v719_v8 = vrot.slane %v711_v7, %v1387_v40  ;;  %v767_v27 = vmax.f32 %v1401_v59, %v1404_v61  ;;  %v472_v28 = vsel %vm471_vm8, %v302_v1, %v306_v2 }
  0xe4   : > { %v1429_v13 = vrot.slane %v573_v4, %v1387_v40  ;;  %v588_v17 = vcombine.high %v1417_v6, %v1417_v6  ;;  %v633_v31 = vrot.slane %v1417_v6, %v1410_v63  ;;  %v671_v33 = vmax.f32 %v669_v14, %v670_v12 }
  0xe5   : > { %v720_v18 = vcombine.high %v719_v8, %v719_v8  ;;  %v1438_v19 = vrot.slane %v719_v8, %v1387_v40  ;;  %v366_v20 = vpop.xlane.xlu1 %365  ;;  %v310_v21 = vpop.xlane.xlu0 %309 }
  0xe6   : > { %v508_v25 = vsel %vm475_vm9, %v507_v15, %v366_v20  ;;  %v589_v26 = vcombine.high %v1429_v13, %v1429_v13  ;;  %v474_v34 = vsel %vm473_vm10, %v472_v28, %v310_v21  ;;  %v637_v35 = vrot.slane %v1429_v13, %v1410_v63 }
  0xe7   : > { %v516_v30 = vrot.slane %v508_v25, %v1387_v40  ;;  %v1459_v32 = vrot.slane %v720_v18, %v1387_v40  ;;  %v641_v36 = vrot.slane %v588_v17, %v1410_v63  ;;  %v735_v5 = vcombine.high %v1438_v19, %v1438_v19 }
  0xe8   : > { %v673_v42 = vmax.f32 %v1377_v29, %v366_v20  ;;  %v645_v45 = vrot.slane %v589_v26, %v1410_v63  ;;  %v740_v46 = vrot.slane %v1438_v19, %v1410_v63 }
  0xe9   : > { %v517_v38 = vcombine.high %v516_v30, %v516_v30  ;;  %v314_v39 = vpop.xlane.xlu1 %313  ;;  %v524_v41 = vrot.slane %v516_v30, %v1387_v40  ;;  %v736_v29 = vcombine.high %v1459_v32, %v1459_v32  ;;  %v744_v49 = vrot.slane %v1459_v32, %v1410_v63 }
  0xea   : > { %v476_v43 = vsel %vm475_vm9, %v474_v34, %v314_v39  ;;  %v672_v44 = vmax.f32 %v310_v21, %v314_v39  ;;  %v748_v57 = vrot.slane %v735_v5, %v1410_v63 }
  0xeb   : > { %v531_v47 = vrot.slane %v517_v38, %v1387_v40  ;;  %v484_v48 = vrot.slane %v476_v43, %v1387_v40  ;;  %v532_v50 = vcombine.high %v524_v41, %v524_v41  ;;  %v593_v53 = vrot.slane %v524_v41, %v1410_v63 }
  0xec   : > { %v674_v51 = vmax.f32 %v672_v44, %v673_v42  ;;  %v752_v28 = vrot.slane %v736_v29, %v1410_v63 }
  0xed   : > { %v533_v52 = vcombine.high %v531_v47, %v531_v47  ;;  %v485_v55 = vcombine.high %v484_v48, %v484_v48  ;;  %v492_v56 = vrot.slane %v484_v48, %v1387_v40  ;;  %v597_v58 = vrot.slane %v531_v47, %v1410_v63 }
  0xee   : > { %v681_v59 = vsel %vm471_vm8, %v671_v33, %v674_v51  ;;  %v766_v60 = vmax.f32 %v671_v33, %v674_v51  ;;  %v601_v61 = vrot.slane %v532_v50, %v1410_v63 }
  0xef   : > { %v499_v62 = vrot.slane %v485_v55, %v1387_v40  ;;  %v500_v0 = vcombine.high %v492_v56, %v492_v56  ;;  %v651_v1 = vsel %vm650_vm11, %v492_v56, %v593_v53  ;;  %v605_v2 = vrot.slane %v533_v52, %v1410_v63 }
  0xf0   : > { %v656_v3 = vsel %vm655_vm12, %v651_v1, %v613_v16  ;;  %v689_v4 = vrot.slane %v681_v59, %v1387_v40  ;;  %v768_v6 = vmax.f32 %v766_v60, %v767_v27 }
  0xf1   : > { %v501_v7 = vcombine.high %v499_v62, %v499_v62  ;;  %v652_v8 = vsel %vm650_vm11, %v499_v62, %v597_v58  ;;  %v653_v12 = vsel %vm650_vm11, %v500_v0, %v601_v61  ;;  %v661_v13 = vsel %vm660_vm13, %v656_v3, %v633_v31 }
  0xf2   : > { %v657_v14 = vsel %vm655_vm12, %v652_v8, %v617_v22  ;;  %v658_v15 = vsel %vm655_vm12, %v653_v12, %v1443_v23  ;;  %665 = vst.msk [vmem:[%s1499_s9] sm:$0xf] %vm299_vm5, %v661_v13  ;;  %v690_v16 = vcombine.high %v689_v4, %v689_v4  ;;  %v697_v17 = vrot.slane %v689_v4, %v1387_v40 }
  0xf3   : > { %v654_v18 = vsel %vm650_vm11, %v501_v7, %v605_v2  ;;  %v662_v19 = vsel %vm660_vm13, %v657_v14, %v637_v35  ;;  %v663_v20 = vsel %vm660_vm13, %v658_v15, %v641_v36  ;;  %v773_v54 = vrot.slane %v768_v6, %v1410_v63 }
  0xf4   : > { %v659_v21 = vsel %vm655_vm12, %v654_v18, %v1446_v24  ;;  %666 = vst.msk [vmem:[%s1499_s9 + $0x4] sm:$0xf] %vm299_vm5, %v662_v19  ;;  %667 = vst.msk [vmem:[%s1499_s9 + $0x8] sm:$0xf] %vm299_vm5, %v663_v20  ;;  %v704_v22 = vrot.slane %v690_v16, %v1387_v40  ;;  %v705_v23 = vcombine.high %v697_v17, %v697_v17 }
  0xf5   : > { %v757_v25 = vsel %vm650_vm11, %v697_v17, %v740_v46  ;;  %v664_v26 = vsel %vm660_vm13, %v659_v21, %v645_v45  ;;  %v777_v24 = vrot.slane %v768_v6, %v776_v9  ;;  %v781_v27 = vrot.slane %v768_v6, %v780_v10  ;;  %791 = vst.msk [vmem:[%s1505_s19] sm:$0x1] %vm790_vm15, %v773_v54 }
  0xf6   : > { %762 = vst.msk [vmem:[%s1513_s22] sm:$0x3] %vm761_vm14, %v757_v25  ;;  %v785_v40 = vrot.slane %v768_v6, %v784_v11  ;;  %v706_v30 = vcombine.high %v704_v22, %v704_v22  ;;  %v758_v31 = vsel %vm650_vm11, %v704_v22, %v744_v49  ;;  %v759_v9 = vsel %vm650_vm11, %v705_v23, %v748_v57 }
  0xf7   : > { %668 = vst.msk [vmem:[%s1499_s9 + $0xc] sm:$0xf] %vm299_vm5, %v664_v26 }
  0xf8   : > { %763 = vst.msk [vmem:[%s1513_s22 + $0x2] sm:$0x3] %vm761_vm14, %v758_v31  ;;  %764 = vst.msk [vmem:[%s1513_s22 + $0x4] sm:$0x3] %vm761_vm14, %v759_v9 }
  0xf9   : > { %792 = vst.msk [vmem:[%s1505_s19 + $0x1] sm:$0x1] %vm790_vm15, %v777_v24  ;;  %793 = vst.msk [vmem:[%s1505_s19 + $0x2] sm:$0x1] %vm790_vm15, %v781_v27 }
  0xfa   : > { %794 = vst.msk [vmem:[%s1505_s19 + $0x3] sm:$0x1] %vm790_vm15, %v785_v40 }
  0xfb   : > { %1121 = shalt.err (!%p1118_p7)
}
  0xfc   : > { %s1122_s8 = scalar_lea.hbm %s1531_s30, 256  ;;  %s1126_s18 = scalar_lea.hbm %s1621_s3, 512 }
  0xfd   : > { %p1123_p10 = scmp.ne.s32.totalorder %s1531_s30, %s1122_s8  ;;  %p1127_p2 = scmp.lt.s32.totalorder %s1531_s30, %s1621_s3 }
  0xfe   : > { %p1128_p8 = scmp.lt.s32.totalorder %s1126_s18, %s1122_s8 }
  0xff   : > { %p1124_p4 = pnand %p1123_p10, %p1268_p9 }
 0x100   : > { %p1129_p12 = por %p1128_p8, %p1127_p2 }
 0x101   : > { %p1125_p13 = pneg %p1124_p4 }
 0x103   : > { %p1130_p0 = pnand %p1129_p12, %p1125_p13 }
 0x105   : > { %1133 = shalt.err (!%p1130_p0)
}
 0x106   : > { %s1195_s21 = smov 64   ;;  %s1196_s23 = smov 4   ;;  %v760_v37 = vsel %vm650_vm11, %v706_v30, %v752_v28 }
 0x107   : > { %1015 = dma.vmem_to_hbm [thread:$0]  (%p1268_p9), %s1533_s10, 256, %s1531_s30, %s813_s4, %s1195_s21, %s1195_s21, %s1196_s23  }
 0x108   : > { %765 = vst.msk [vmem:[%s1513_s22 + $0x6] sm:$0x3] %vm761_vm14, %v760_v37 }
 0x109 PF: > { %s874_s29 = sand.u32 1, %s1168_s12   ;;  %p1627_p1 = scmp.ge.s32.totalorder %s1188_s17, 2 }
 0x10a   : > { %s875_s24 = scalar_lea.sflag [#allocation4], %s874_s29 }
 0x10b   : > { %p1022_p3 = pnand %p1627_p1, %p1275_p11 }
 0x10d   : > { %p1023_p5 = pneg %p1022_p3 }
 0x10f   : > { %1163 = dma.done.wait (%p1023_p5), %s875_s24, 256  }
 0x110   : > { %1165 = vsyncadd (%p1023_p5), %s875_s24, 4294967040  ;;  %s20_s17 = sadd.s32 1, %s1188_s17   ;;  %s1628_s12 = smov %s1172_s13 }
 0x111   : > { %p17_p6 = scmp.ge.s32.totalorder %s20_s17, 4   ;;  %s1629_s13 = smov %s1176_s14 }
 0x112   : > { %s1630_s14 = smov %s1273_s26  ;;  %s1631_s15 = smov %s1184_s16 }
 0x113   : > { %s1632_s16 = smov %s1634_s20  ;;  %19 = sbr.rel (!%p17_p6) target bundleno = 6 (0x6), region = 93 }
 0x118   :  { %880 = vsyncpa [#allocation3], 1 }
 0x119   :  { %882 = vsyncpa [#allocation3 + $0x1], 1 }
 0x11a   :  { %883 = vsyncpa [#allocation4], 1 }
 0x11b   :  { %885 = vsyncpa [#allocation4 + $0x1], 1 }

</bundles_post_ra>
